<compile_context>
chip_gen: v7x
topology: tpu7x:2x2x1
jax: 0.10.0
libtpu: 0.0.40
codegen_flags: <defaults>
</compile_context>

<pallas_src>
from functools import partial

import jax
import jax.numpy as jnp
from jax.experimental import pallas as pl
from jax.experimental.pallas import tpu as pltpu


def _round_up(x, m):
    return ((x + m - 1) // m) * m


# --------------------------------------------------------------- kernel 1: ans_vec
def ansvec_kernel(x_ref, xw_ref, q_ref,
                  w1x_ref, w1q_ref, b1_ref, w2_ref, b2_ref,
                  a_ref):
    # weighted pooling over objects: (X_weights_in.unsqueeze(2) * X).sum(axis=1)
    X = x_ref[...]                                     # [TBX, N_o, d_o] f32
    w = xw_ref[...]                                    # [TBX, N_o]      f32
    weighted_X = jnp.sum(w[:, :, None] * X, axis=1)    # [TBX, d_o]

    # CW_ans: Linear on concat([weighted_X, question_op]) -> d_a (split matmuls)
    h = (jnp.dot(weighted_X, w1x_ref[...], preferred_element_type=jnp.float32)
         + jnp.dot(q_ref[...], w1q_ref[...], preferred_element_type=jnp.float32)
         + b1_ref[...])                                # [TBX, d_a]
    h = jnp.maximum(h, 0.0)                            # ReLU

    # W_ans2: Linear(d_a -> d_a)
    a_ref[...] = (jnp.dot(h, w2_ref[...], preferred_element_type=jnp.float32)
                  + b2_ref[...]).astype(a_ref.dtype)


# --------------------------------------------------------------- kernel 2: logits
def logits_kernel(a_ref, ea_t_ref, out_ref):
    # logits tile = ans_vec @ E_a.T[:, v*TV:(v+1)*TV]; f32 accumulation on the MXU.
    ea = ea_t_ref[...]                                 # [d_a, TV] (bf16 or f32)
    out_ref[...] = jnp.dot(a_ref[...].astype(ea.dtype), ea,
                           preferred_element_type=jnp.float32).astype(out_ref.dtype)


# --------------------------------------------------------- tiling / padding helpers
def _choose_tv(V, d_a, ea_bytes, tv_max=2048, vmem_budget=20 * 1024 * 1024):
    """Lane-dense vocab tile: prefer ~2048 lanes; prefer a TV that divides
    round_up(V, 128) to avoid padded columns; shrink to fit the VMEM budget."""
    v128 = _round_up(V, 128)
    if v128 <= tv_max:
        tv = v128
    else:
        tv = 128
        for cand in range(tv_max, 127, -128):
            if v128 % cand == 0:
                tv = cand
                break
        if tv < 1024:            # no decent divisor; accept up to TV-1 padded cols
            tv = tv_max

    def need(t):                 # double-buffered ea_t + out + a blocks
        return 2 * (d_a * t * ea_bytes + 128 * t * 4 + 128 * d_a * 4)

    while tv > 128 and need(tv) > vmem_budget:
        tv -= 128
    return max(tv, 128)


def _choose_tb(B, cap=128):
    """Batch tile: multiple of 8, capped at 128, chosen to keep B_pad/B close to 1."""
    if B <= cap:
        return _round_up(B, 8)
    n_tiles = -(-B // cap)
    return _round_up(-(-B // n_tiles), 8)


# --------------------------------------------------------------- one-time param prep
def prepare_params(params, d_o, logits_dtype=jnp.bfloat16):
    """Call ONCE at parameter-load time: splits/transposes the weights and pads the
    vocab axis of E_a.T so no per-call transpose/pad of the (largest) table is needed.
    E_a.T streams in bf16 by default (f32 MXU accumulation); pass jnp.float32 for
    bit-exact parity with the f32 reference."""
    V, d_a = params["E_a"].shape
    w1x = jnp.asarray(params["W1"][:, :d_o].T, jnp.float32)       # [d_o, d_a]
    w1q = jnp.asarray(params["W1"][:, d_o:].T, jnp.float32)       # [d_c, d_a]
    b1 = jnp.asarray(params["b1"], jnp.float32)[None, :]          # [1, d_a]
    w2 = jnp.asarray(params["W2"].T, jnp.float32)                 # [d_a, d_a]
    b2 = jnp.asarray(params["b2"], jnp.float32)[None, :]          # [1, d_a]

    ea_bytes = jnp.dtype(logits_dtype).itemsize
    TV = _choose_tv(V, d_a, ea_bytes)
    V_pad = _round_up(V, TV)
    ea_t = jnp.asarray(params["E_a"].T, logits_dtype)             # [d_a, V]
    if V_pad != V:
        ea_t = jnp.pad(ea_t, ((0, 0), (0, V_pad - V)))            # padded cols -> 0

    return {"w1x": w1x, "w1q": w1q, "b1": b1, "w2": w2, "b2": b2,
            "ea_t": ea_t, "TV": TV, "V": V}


# ----------------------------------------------------------------------- forward pass
@partial(jax.jit, static_argnames=("tv", "v_real"))
def _answer_forward_impl(X, X_weights_in, question_op,
                         w1x, w1q, b1, w2, b2, ea_t, *, tv, v_real):
    B, N_o, d_o = X.shape
    d_c = question_op.shape[1]
    d_a = w1x.shape[1]
    V_pad = ea_t.shape[1]

    TB = _choose_tb(B)
    B_pad = _round_up(B, TB)
    if B_pad != B:
        pad = B_pad - B
        X = jnp.pad(X, ((0, pad), (0, 0), (0, 0)))
        X_weights_in = jnp.pad(X_weights_in, ((0, pad), (0, 0)))
        question_op = jnp.pad(question_op, ((0, pad), (0, 0)))

    # ---- pass 1: ans_vec.  Guard the X block VMEM footprint (v7x has 64 MiB VMEM,
    # default scoped limit is 16-32 MiB); 8 always divides TB so the grids line up.
    x_block_bytes = TB * N_o * d_o * 4
    TBX = TB if 2 * x_block_bytes <= 8 * 1024 * 1024 else 8

    a = pl.pallas_call(
        ansvec_kernel,
        out_shape=jax.ShapeDtypeStruct((B_pad, d_a), jnp.float32),
        grid_spec=pltpu.PrefetchScalarGridSpec(
            num_scalar_prefetch=0,
            grid=(B_pad // TBX,),
            in_specs=[
                pl.BlockSpec((TBX, N_o, d_o), lambda i: (i, 0, 0)),
                pl.BlockSpec((TBX, N_o), lambda i: (i, 0)),
                pl.BlockSpec((TBX, d_c), lambda i: (i, 0)),
                pl.BlockSpec((d_o, d_a), lambda i: (0, 0)),
                pl.BlockSpec((d_c, d_a), lambda i: (0, 0)),
                pl.BlockSpec((1, d_a), lambda i: (0, 0)),
                pl.BlockSpec((d_a, d_a), lambda i: (0, 0)),
                pl.BlockSpec((1, d_a), lambda i: (0, 0)),
            ],
            out_specs=pl.BlockSpec((TBX, d_a), lambda i: (i, 0)),
        ),
        compiler_params=pltpu.CompilerParams(
            dimension_semantics=("parallel",)),
    )(X, X_weights_in, question_op, w1x, w1q, b1, w2, b2)

    # ---- pass 2: logits = a @ E_a.T.  Vocab axis leads (megacore shards it on
    # v7x); batch is innermost so each ea_t tile is fetched from HBM once total.
    ea_bytes = jnp.dtype(ea_t.dtype).itemsize
    vmem_need = 2 * (d_a * tv * ea_bytes + TB * tv * 4 + TB * d_a * 4) + (1 << 20)
    vmem_limit = int(min(64 * 1024 * 1024, max(32 * 1024 * 1024, 2 * vmem_need)))

    out = pl.pallas_call(
        logits_kernel,
        out_shape=jax.ShapeDtypeStruct((B_pad, V_pad), jnp.float32),
        grid_spec=pltpu.PrefetchScalarGridSpec(
            num_scalar_prefetch=0,
            grid=(V_pad // tv, B_pad // TB),
            in_specs=[
                pl.BlockSpec((TB, d_a), lambda v, b: (b, 0)),   # small, resident-ish
                pl.BlockSpec((d_a, tv), lambda v, b: (0, v)),   # the only large stream
            ],
            out_specs=pl.BlockSpec((TB, tv), lambda v, b: (b, v)),  # lane-dense vst
        ),
        compiler_params=pltpu.CompilerParams(
            dimension_semantics=("parallel", "parallel"),
            vmem_limit_bytes=vmem_limit),
    )(a, ea_t)

    # Avoid the extra HBM copy when there is no padding to strip.
    if B_pad == B and V_pad == v_real:
        return out
    return out[:B, :v_real]


def transformer_answer_forward(X, X_weights_in, question_op, prepped):
    """X: [B, N_o, d_o], X_weights_in: [B, N_o], question_op: [B, d_c] -> logits [B, V]."""
    return _answer_forward_impl(
        X, X_weights_in, question_op,
        prepped["w1x"], prepped["w1q"], prepped["b1"],
        prepped["w2"], prepped["b2"], prepped["ea_t"],
        tv=prepped["TV"], v_real=prepped["V"])


# -------------------------------------------------------------------- pure-JAX reference
def _reference_forward(X, X_weights_in, question_op, params):
    weighted_X = jnp.sum(X_weights_in[:, :, None] * X, axis=1)
    inp = jnp.concatenate([weighted_X, question_op], axis=-1)
    h = jax.nn.relu(inp @ params["W1"].T + params["b1"])
    a = h @ params["W2"].T + params["b2"]
    return a @ params["E_a"].T


if __name__ == "__main__":
    # Small shapes consistent with forward(): X:[B,N_o,d_o], weights:[B,N_o], q:[B,d_c].
    # V chosen so the vocab axis exercises multiple lane-dense tiles.
    B, N_o, d_o, d_c, d_a, V = 2, 8, 32, 32, 32, 5000

    key = jax.random.PRNGKey(0)
    ks = jax.random.split(key, 8)

    X = jax.random.normal(ks[0], (B, N_o, d_o), dtype=jnp.float32)
    X_weights_in = jax.nn.softmax(
        jax.random.normal(ks[1], (B, N_o), dtype=jnp.float32), axis=-1)
    question_op = jax.random.normal(ks[2], (B, d_c), dtype=jnp.float32)

    # Deterministic parameter init (synthetic; shapes follow the assumed Linears + Embedding)
    params = {
        # CW_ans: Linear(d_o + d_c, d_a)  (PyTorch convention: weight [out, in])
        "W1": jax.random.uniform(ks[3], (d_a, d_o + d_c), jnp.float32,
                                 -1.0 / (d_o + d_c) ** 0.5, 1.0 / (d_o + d_c) ** 0.5),
        "b1": jnp.zeros((d_a,), jnp.float32),
        # W_ans2: Linear(d_a, d_a)
        "W2": jax.random.uniform(ks[4], (d_a, d_a), jnp.float32,
                                 -1.0 / d_a ** 0.5, 1.0 / d_a ** 0.5),
        "b2": jnp.zeros((d_a,), jnp.float32),
        # Embedding(len(vocab), d_a), init normal(0, d_a ** -0.5)
        "E_a": jax.random.normal(ks[5], (V, d_a), jnp.float32) * (d_a ** -0.5),
    }

    ref = _reference_forward(X, X_weights_in, question_op, params)

    # --- f32 embedding path: exact parity with the reference ------------------------
    prepped_f32 = prepare_params(params, d_o, logits_dtype=jnp.float32)
    logits_f32 = transformer_answer_forward(X, X_weights_in, question_op, prepped_f32)
    logits_f32 = jax.block_until_ready(logits_f32)
    assert logits_f32.shape == (B, V)
    assert jnp.allclose(logits_f32, ref, atol=1e-4, rtol=1e-4)

    # --- default bf16-streamed embedding path (halves HBM bytes of the big matmul) --
    prepped = prepare_params(params, d_o)                       # bf16 by default
    logits = transformer_answer_forward(X, X_weights_in, question_op, prepped)
    logits = jax.block_until_ready(logits)
    assert logits.shape == (B, V)
    assert jnp.allclose(logits, ref, atol=5e-2, rtol=5e-2)      # bf16 drift tolerance

    print("KERNEL_OK")
</pallas_src>

<mosaic_0001>
module attributes {stable_mosaic.version = 11 : i64} {
  func.func @ansvec_kernel(%arg0: i32, %arg1: memref<8x8x32xf32, #tpu.memory_space<vmem>>, %arg2: memref<8x8xf32, #tpu.memory_space<vmem>>, %arg3: memref<8x32xf32, #tpu.memory_space<vmem>>, %arg4: memref<32x32xf32, #tpu.memory_space<vmem>>, %arg5: memref<32x32xf32, #tpu.memory_space<vmem>>, %arg6: memref<1x32xf32, #tpu.memory_space<vmem>>, %arg7: memref<32x32xf32, #tpu.memory_space<vmem>>, %arg8: memref<1x32xf32, #tpu.memory_space<vmem>>, %arg9: memref<8x32xf32, #tpu.memory_space<vmem>>) attributes {dimension_semantics = [#tpu.dimension_semantics<parallel>], iteration_bounds = array<i64: 1>, scalar_prefetch = 0 : i64, scratch_operands = 0 : i64, tpu.core_type = #tpu.core_type<tc>, window_params = [{transform_indices = @transform_0, window_bounds = array<i64: 8, 8, 32>}, {transform_indices = @transform_1, window_bounds = array<i64: 8, 8>}, {transform_indices = @transform_2, window_bounds = array<i64: 8, 32>}, {pipeline_mode = #tpu.pipeline_mode<synchronous>, transform_indices = @transform_3, window_bounds = array<i64: 32, 32>}, {pipeline_mode = #tpu.pipeline_mode<synchronous>, transform_indices = @transform_4, window_bounds = array<i64: 32, 32>}, {pipeline_mode = #tpu.pipeline_mode<synchronous>, transform_indices = @transform_5, window_bounds = array<i64: 1, 32>}, {pipeline_mode = #tpu.pipeline_mode<synchronous>, transform_indices = @transform_6, window_bounds = array<i64: 32, 32>}, {pipeline_mode = #tpu.pipeline_mode<synchronous>, transform_indices = @transform_7, window_bounds = array<i64: 1, 32>}, {transform_indices = @transform_8, window_bounds = array<i64: 8, 32>}]} {
    %c0 = arith.constant 0 : index
    %c0_0 = arith.constant 0 : index
    %c0_1 = arith.constant 0 : index
    %0 = vector.load %arg1[%c0, %c0_0, %c0_1] : memref<8x8x32xf32, #tpu.memory_space<vmem>>, vector<8x8x32xf32>
    %c0_2 = arith.constant 0 : index
    %c0_3 = arith.constant 0 : index
    %1 = vector.load %arg2[%c0_2, %c0_3] : memref<8x8xf32, #tpu.memory_space<vmem>>, vector<8x8xf32>
    %2 = vector.shape_cast %1 : vector<8x8xf32> to vector<8x8x1xf32>
    %3 = vector.broadcast %2 : vector<8x8x1xf32> to vector<8x8x32xf32>
    %4 = arith.mulf %3, %0 : vector<8x8x32xf32>
    %cst = arith.constant dense<0.000000e+00> : vector<8x32xf32>
    %5 = vector.multi_reduction <add>, %4, %cst [1] : vector<8x8x32xf32> to vector<8x32xf32>
    %c0_4 = arith.constant 0 : index
    %c0_5 = arith.constant 0 : index
    %6 = vector.load %arg4[%c0_4, %c0_5] : memref<32x32xf32, #tpu.memory_space<vmem>>, vector<32x32xf32>
    %cst_6 = arith.constant dense<0.000000e+00> : vector<8x32xf32>
    %7 = tpu.matmul %5, %6, %cst_6 {dimension_numbers = #tpu.dot_dimension_numbers<[1], [0], [0], [1], [0, 0, 1, 1], [], []>} : vector<8x32xf32>, vector<32x32xf32>, vector<8x32xf32> -> vector<8x32xf32>
    %c0_7 = arith.constant 0 : index
    %c0_8 = arith.constant 0 : index
    %8 = vector.load %arg3[%c0_7, %c0_8] : memref<8x32xf32, #tpu.memory_space<vmem>>, vector<8x32xf32>
    %c0_9 = arith.constant 0 : index
    %c0_10 = arith.constant 0 : index
    %9 = vector.load %arg5[%c0_9, %c0_10] : memref<32x32xf32, #tpu.memory_space<vmem>>, vector<32x32xf32>
    %cst_11 = arith.constant dense<0.000000e+00> : vector<8x32xf32>
    %10 = tpu.matmul %8, %9, %cst_11 {dimension_numbers = #tpu.dot_dimension_numbers<[1], [0], [0], [1], [0, 0, 1, 1], [], []>} : vector<8x32xf32>, vector<32x32xf32>, vector<8x32xf32> -> vector<8x32xf32>
    %11 = arith.addf %7, %10 : vector<8x32xf32>
    %c0_12 = arith.constant 0 : index
    %c0_13 = arith.constant 0 : index
    %12 = vector.load %arg6[%c0_12, %c0_13] : memref<1x32xf32, #tpu.memory_space<vmem>>, vector<1x32xf32>
    %13 = vector.broadcast %12 : vector<1x32xf32> to vector<8x32xf32>
    %14 = arith.addf %11, %13 : vector<8x32xf32>
    %cst_14 = arith.constant 0.000000e+00 : f32
    %15 = vector.broadcast %cst_14 : f32 to vector<8x32xf32>
    %16 = arith.maximumf %14, %15 : vector<8x32xf32>
    %c0_15 = arith.constant 0 : index
    %c0_16 = arith.constant 0 : index
    %17 = vector.load %arg7[%c0_15, %c0_16] : memref<32x32xf32, #tpu.memory_space<vmem>>, vector<32x32xf32>
    %cst_17 = arith.constant dense<0.000000e+00> : vector<8x32xf32>
    %18 = tpu.matmul %16, %17, %cst_17 {dimension_numbers = #tpu.dot_dimension_numbers<[1], [0], [0], [1], [0, 0, 1, 1], [], []>} : vector<8x32xf32>, vector<32x32xf32>, vector<8x32xf32> -> vector<8x32xf32>
    %c0_18 = arith.constant 0 : index
    %c0_19 = arith.constant 0 : index
    %19 = vector.load %arg8[%c0_18, %c0_19] : memref<1x32xf32, #tpu.memory_space<vmem>>, vector<1x32xf32>
    %20 = vector.broadcast %19 : vector<1x32xf32> to vector<8x32xf32>
    %21 = arith.addf %18, %20 : vector<8x32xf32>
    %c0_20 = arith.constant 0 : index
    %c0_21 = arith.constant 0 : index
    %22 = vector.load %arg9[%c0_20, %c0_21] : memref<8x32xf32, #tpu.memory_space<vmem>>, vector<8x32xf32>
    tpu.vector_store %arg9[%c0_20, %c0_21], %21 {strides = array<i32>} : memref<8x32xf32, #tpu.memory_space<vmem>>, vector<8x32xf32>,
    return
  }
  func.func @transform_0(%arg0: i32) -> (i32, i32, i32) {
    %c0_i32 = arith.constant 0 : i32
    %c0_i32_0 = arith.constant 0 : i32
    %c0_i32_1 = arith.constant 0 : i32
    return %arg0, %c0_i32, %c0_i32_0 : i32, i32, i32
  }
  func.func @transform_1(%arg0: i32) -> (i32, i32) {
    %c0_i32 = arith.constant 0 : i32
    %c0_i32_0 = arith.constant 0 : i32
    return %arg0, %c0_i32 : i32, i32
  }
  func.func @transform_2(%arg0: i32) -> (i32, i32) {
    %c0_i32 = arith.constant 0 : i32
    %c0_i32_0 = arith.constant 0 : i32
    return %arg0, %c0_i32 : i32, i32
  }
  func.func @transform_3(%arg0: i32) -> (i32, i32) {
    %c0_i32 = arith.constant 0 : i32
    %c0_i32_0 = arith.constant 0 : i32
    %c0_i32_1 = arith.constant 0 : i32
    return %c0_i32, %c0_i32_0 : i32, i32
  }
  func.func @transform_4(%arg0: i32) -> (i32, i32) {
    %c0_i32 = arith.constant 0 : i32
    %c0_i32_0 = arith.constant 0 : i32
    %c0_i32_1 = arith.constant 0 : i32
    return %c0_i32, %c0_i32_0 : i32, i32
  }
  func.func @transform_5(%arg0: i32) -> (i32, i32) {
    %c0_i32 = arith.constant 0 : i32
    %c0_i32_0 = arith.constant 0 : i32
    %c0_i32_1 = arith.constant 0 : i32
    return %c0_i32, %c0_i32_0 : i32, i32
  }
  func.func @transform_6(%arg0: i32) -> (i32, i32) {
    %c0_i32 = arith.constant 0 : i32
    %c0_i32_0 = arith.constant 0 : i32
    %c0_i32_1 = arith.constant 0 : i32
    return %c0_i32, %c0_i32_0 : i32, i32
  }
  func.func @transform_7(%arg0: i32) -> (i32, i32) {
    %c0_i32 = arith.constant 0 : i32
    %c0_i32_0 = arith.constant 0 : i32
    %c0_i32_1 = arith.constant 0 : i32
    return %c0_i32, %c0_i32_0 : i32, i32
  }
  func.func @transform_8(%arg0: i32) -> (i32, i32) {
    %c0_i32 = arith.constant 0 : i32
    %c0_i32_0 = arith.constant 0 : i32
    return %arg0, %c0_i32 : i32, i32
  }
}

module attributes {stable_mosaic.version = 11 : i64} {
  func.func @logits_kernel(%arg0: i32, %arg1: i32, %arg2: memref<8x32xf32, #tpu.memory_space<vmem>>, %arg3: memref<32x1280xf32, #tpu.memory_space<vmem>>, %arg4: memref<8x1280xf32, #tpu.memory_space<vmem>>) attributes {dimension_semantics = [#tpu.dimension_semantics<parallel>, #tpu.dimension_semantics<parallel>], iteration_bounds = array<i64: 4, 1>, scalar_prefetch = 0 : i64, scratch_operands = 0 : i64, tpu.core_type = #tpu.core_type<tc>, window_params = [{transform_indices = @transform_0, window_bounds = array<i64: 8, 32>}, {transform_indices = @transform_1, window_bounds = array<i64: 32, 1280>}, {transform_indices = @transform_2, window_bounds = array<i64: 8, 1280>}]} {
    %c0 = arith.constant 0 : index
    %c0_0 = arith.constant 0 : index
    %0 = vector.load %arg3[%c0, %c0_0] : memref<32x1280xf32, #tpu.memory_space<vmem>>, vector<32x1280xf32>
    %c0_1 = arith.constant 0 : index
    %c0_2 = arith.constant 0 : index
    %1 = vector.load %arg2[%c0_1, %c0_2] : memref<8x32xf32, #tpu.memory_space<vmem>>, vector<8x32xf32>
    %cst = arith.constant dense<0.000000e+00> : vector<8x1280xf32>
    %2 = tpu.matmul %1, %0, %cst {dimension_numbers = #tpu.dot_dimension_numbers<[1], [0], [0], [1], [0, 0, 1, 1], [], []>} : vector<8x32xf32>, vector<32x1280xf32>, vector<8x1280xf32> -> vector<8x1280xf32>
    %c0_3 = arith.constant 0 : index
    %c0_4 = arith.constant 0 : index
    %3 = vector.load %arg4[%c0_3, %c0_4] : memref<8x1280xf32, #tpu.memory_space<vmem>>, vector<8x1280xf32>
    tpu.vector_store %arg4[%c0_3, %c0_4], %2 {strides = array<i32>} : memref<8x1280xf32, #tpu.memory_space<vmem>>, vector<8x1280xf32>,
    return
  }
  func.func @transform_0(%arg0: i32, %arg1: i32) -> (i32, i32) {
    %c0_i32 = arith.constant 0 : i32
    %c0_i32_0 = arith.constant 0 : i32
    return %arg1, %c0_i32 : i32, i32
  }
  func.func @transform_1(%arg0: i32, %arg1: i32) -> (i32, i32) {
    %c0_i32 = arith.constant 0 : i32
    %c0_i32_0 = arith.constant 0 : i32
    return %c0_i32, %arg0 : i32, i32
  }
  func.func @transform_2(%arg0: i32, %arg1: i32) -> (i32, i32) {
    %c0_i32 = arith.constant 0 : i32
    return %arg1, %arg0 : i32, i32
  }
}

</mosaic_0001>

<bundles_post_ra>
// kernel: _answer_forward_impl.3
= control target key start
LH: loop header
LB: loop body
LE: loop exit
PB: predicated region body
PF: predicated region fallthrough
CT: control target
= control target key end

     0   :  { %7 = vsyncpa [#allocation3], 0  ;;  %s1115_s0 = inlined_call_operand.vmem [shape: f32[8,32], index: 0, kind: input, shape index: {}]   ;;  %s1116_s1 = inlined_call_operand.hbm [shape: f32[32,5120], index: 1, kind: input, shape index: {}]   ;;  %s1117_s2 = inlined_call_operand.vmem [shape: f32[8,5120], index: 2, kind: output, shape index: {}]  }
   0x1   :  { %9 = vsyncpa [#allocation3 + $0x1], 0  ;;  %s941_s9 = smov 0   ;;  %s943_s10 = smov 0  }
   0x2   :  { %s945_s11 = smov 0   ;;  %s947_s12 = smov 0  }
   0x3   :  { %s949_s13 = smov 0   ;;  %s951_s14 = smov 0  }
   0x4 LB: > { %s722_s15 = sadd.s32 4294967295, %s919_s14   ;;  %s27_s16 = sadd.s32 1, %s915_s13  ;;  %s919_s14 = sphi %s951_s14, %s15_s14   ;;  %s915_s13 = sphi %s949_s13, %s1125_s13   ;;  %s911_s12 = sphi %s947_s12, %s1124_s12   ;;  %s907_s11 = sphi %s945_s11, %s1123_s11   ;;  %s903_s10 = sphi %s943_s10, %s1122_s10   ;;  %s899_s9 = sphi %s941_s9, %s1121_s9  }
   0x5   : > { %p29_p0 = scmp.ge.s32.totalorder %s27_s16, 4  ;;  %s60_s17 = sadd.s32 1, %s907_s11 }
   0x6   : > { %p67_p1 = scmp.ne.s32.totalorder %s907_s11, %s903_s10  ;;  %p68_p2 = scmp.eq.s32.totalorder %s919_s14, 0 }
   0x7   : > { %s1127_s16 = smov (%p29_p0, %s27_s16), 0  ;;  %p73_p4 = scmp.ne.s32.totalorder %s903_s10, %s899_s9 }
   0x8   : > { %p69_p3 = por %p68_p2, %p67_p1  ;;  %s57_s18 = ssub.s32 %s915_s13, %s1127_s16 }
   0x9   : > { %p74_p5 = scmp.eq.s32.totalorder %s722_s15, 0  ;;  %p58_p6 = scmp.eq.s32.totalorder %s57_s18, 0 }
   0xa   : > { %p786_p8 = scmp.lt.s32.totalorder %s919_s14, 4  ;;  %s132_s21 = sand.u32 1, %s907_s11  }
   0xb   : > { %p980_p7 = por %p74_p5, %p73_p4  ;;  %s737_s22 = smul.u32 1280, %s915_s13 }
   0xc   : > { %s986_s20 = scalar_select %p58_p6, %s907_s11, %s60_s17  }
   0xd   : > { %s778_s23 = smul.u32 320, %s132_s21  ;;  %s993_s26 = scalar_lea.hbm %s1116_s1, %s737_s22 }
   0xe   : > { %p995_p9 = pnand %p786_p8, %p69_p3  ;;  %s1002_s30 = scalar_lea.sflag [#allocation3], %s132_s21 }
   0xf   : > { %s136_s28 = scalar_lea.vmem [#allocation2], %s778_s23  ;;  %s839_s3 = scalar_lea.hbm %s993_s26, 5120 }
  0x10   : > { %s143_s29 = sshll.u32 %s136_s28, 4  ;;  %p840_p11 = scmp.ne.s32.totalorder %s993_s26, %s839_s3  ;;  %s999_s29 = int_to_ptr.vmem [resolvable:$true] %s143_s29 }
  0x11   : > { %p841_p12 = pneg %p995_p9  ;;  %s844_s6 = scalar_lea.hbm %s1116_s1, 20480 }
  0x12   : > { %p845_p1 = scmp.lt.u32.totalorder %s993_s26, %s1116_s1  ;;  %p846_p2 = scmp.lt.u32.totalorder %s844_s6, %s839_s3 }
  0x13   : > { %p842_p13 = pnand %p841_p12, %p840_p11  ;;  %p848_p4 = scmp.lt.u32.totalorder %s839_s3, %s993_s26 }
  0x14   : > { %p847_p3 = por %p846_p2, %p845_p1 }
  0x15   : > { %p843_p0 = pneg %p842_p13 }
  0x16   : > { %p849_p5 = por %p848_p4, %p847_p3 }
  0x18   : > { %p850_p6 = pnand %p849_p5, %p843_p0 }
  0x1a   : > { %853 = shalt.err (!%p850_p6)
}
  0x1b   : > { %s854_s9 = scalar_lea.vmem %s999_s29, 5120  ;;  %s921_s15 = smov [#allocation2]  }
  0x1c   : > { %p855_p8 = scmp.ne.s32.totalorder %s999_s29, %s854_s9  ;;  %s859_s17 = sshll.u32 %s921_s15, 4  ;;  %s860_s17 = int_to_ptr.vmem [resolvable:$false] %s859_s17 }
  0x1d   : > { %s861_s18 = scalar_lea.vmem %s860_s17, 10240  ;;  %p862_p10 = scmp.lt.s32.totalorder %s999_s29, %s860_s17 }
  0x1e   : > { %p857_p11 = pnand %p855_p8, %p841_p12  ;;  %p863_p1 = scmp.lt.s32.totalorder %s861_s18, %s854_s9 }
  0x20   : > { %p858_p13 = pneg %p857_p11  ;;  %p864_p2 = por %p863_p1, %p862_p10 }
  0x22   : > { %p865_p3 = pnand %p864_p2, %p858_p13 }
  0x24   : > { %868 = shalt.err (!%p865_p3)
}
  0x25   : > { %s922_s21 = smov 5120   ;;  %s923_s22 = smov 1280  }
  0x26   : > { %s924_s23 = smov 80   ;;  %p151_p12 = scmp.lt.s32.totalorder %s919_s14, 5 }
  0x27   : > { %785 = dma.hbm_to_vmem [thread:$0]  (!%p995_p9), %s993_s26, 5120, %s999_s29, %s1002_s30, %s922_s21, %s923_s22, %s924_s23  }
  0x28   : > { %p1120_p0 = scmp.ge.s32.totalorder %s919_s14, 1 }
  0x2a   : > { %p152_p4 = pnand %p1120_p0, %p151_p12 }
  0x2b   : > { %s157_s24 = sand.u32 (!%p152_p4), 1, %s903_s10  }
  0x2c   : > { %155 = sbr.rel (%p152_p4) target bundleno = 293 (0x125), region = 28  ;;  %s158_s28 = scalar_lea.sflag (!%p152_p4), [#allocation3], %s157_s24 }
  0x2d   : > { %s779_s25 = smul.u32 (!%p152_p4), 320, %s157_s24 }
  0x2f   : > { %s1034_s3 = scalar_lea.vmem (!%p152_p4), [#allocation2], %s779_s25 }
  0x33   : > { %894 = dma.done.wait (%p980_p7), %s158_s28, 5120  }
  0x34   : > { %896 = vsyncadd (%p980_p7), %s158_s28, 4294962176  ;;  %v925_v0 = vmov 0.0   ;;  %v206_v1 = vld [vmem:[%s1034_s3 + $0x8] sm:$0xff]  ;;  %v216_v2 = vld [vmem:[%s1034_s3 + $0x58] sm:$0xff]  ;;  %vm246_vm0 = vcmask 261120   ;;  %s195_s27 = smul.u32 10, %s911_s12 }
  0x35   : > { %314 = vmatprep.mubr.f32.mxu0 %v925_v0  ;;  %385 = vmatprep.mubr.f32.mxu1 %v925_v0  ;;  %v205_v3 = vld [vmem:[%s1034_s3] sm:$0xff]  ;;  %v738_v4 = vpack.c.bf16 %v216_v2, %v206_v1  ;;  %v215_v5 = vld [vmem:[%s1034_s3 + $0x50] sm:$0xff]  ;;  %v226_v6 = vld [vmem:[%s1034_s3 + $0xa8] sm:$0xff] }
  0x36   : > { %v236_v7 = vld [vmem:[%s1034_s3 + $0xf8] sm:$0xff]  ;;  %v740_v8 = vpack.c.bf16 %v215_v5, %v205_v3  ;;  %v225_v10 = vld [vmem:[%s1034_s3 + $0xa0] sm:$0xff]  ;;  %v235_v11 = vld [vmem:[%s1034_s3 + $0xf0] sm:$0xff]  ;;  %p198_p7 = scmp.lt.s32.totalorder %s195_s27, 39 }
  0x37   : > { %v742_v9 = vpack.c.bf16 %v236_v7, %v226_v6  ;;  %v208_v12 = vld [vmem:[%s1034_s3 + $0x18] sm:$0xff]  ;;  %739 = vmatprep.subr.bf16.mxu0 %v738_v4  ;;  %v218_v13 = vld [vmem:[%s1034_s3 + $0x68] sm:$0xff]  ;;  %v207_v14 = vld [vmem:[%s1034_s3 + $0x10] sm:$0xff]  ;;  %v744_v15 = vpack.c.bf16 %v235_v11, %v225_v10 }
  0x38   : > { %741 = vmatpush1.bf16.msra.mxu0 %v740_v8  ;;  %v746_v16 = vpack.c.bf16 %v218_v13, %v208_v12  ;;  %v217_v17 = vld [vmem:[%s1034_s3 + $0x60] sm:$0xff]  ;;  %v210_v18 = vld [vmem:[%s1034_s3 + $0x28] sm:$0xff]  ;;  %v220_v19 = vld [vmem:[%s1034_s3 + $0x78] sm:$0xff]  ;;  %s1129_s27 = smov (!%p198_p7, %s195_s27), 39 }
  0x39   : > { %743 = vmatprep.subr.bf16.mxu0 %v742_v9  ;;  %v748_v20 = vpack.c.bf16 %v217_v17, %v207_v14  ;;  %v754_v21 = vpack.c.bf16 %v220_v19, %v210_v18  ;;  %v209_v22 = vld [vmem:[%s1034_s3 + $0x20] sm:$0xff]  ;;  %v219_v23 = vld [vmem:[%s1034_s3 + $0x70] sm:$0xff]  ;;  %v228_v24 = vld [vmem:[%s1034_s3 + $0xb8] sm:$0xff]  ;;  %s729_s29 = sshll.u32 %s1129_s27, 3 }
  0x3a   : > { %747 = vmatprep.subr.bf16.mxu1 %v746_v16  ;;  %v238_v25 = vld [vmem:[%s1034_s3 + $0x108] sm:$0xff]  ;;  %v227_v26 = vld [vmem:[%s1034_s3 + $0xb0] sm:$0xff]  ;;  %v237_v27 = vld [vmem:[%s1034_s3 + $0x100] sm:$0xff]  ;;  %v756_v33 = vpack.c.bf16 %v219_v23, %v209_v22  ;;  %s203_s5 = scalar_lea.vmem %s1117_s2, %s729_s29 }
  0x3b   : > { %v245_v28 = vld [vmem:[%s1115_s0] sm:$0xff]  ;;  %749 = vmatpush1.bf16.msra.mxu1 %v748_v20  ;;  %v750_v29 = vpack.c.bf16 %v238_v25, %v228_v24  ;;  %v752_v30 = vpack.c.bf16 %v237_v27, %v227_v26  ;;  %v230_v31 = vld [vmem:[%s1034_s3 + $0xc8] sm:$0xff]  ;;  %v240_v32 = vld [vmem:[%s1034_s3 + $0x118] sm:$0xff] }
  0x3c   : > { %745 = vmatpush1.bf16.msra.mxu0 %v744_v15  ;;  %v229_v34 = vld [vmem:[%s1034_s3 + $0xc0] sm:$0xff]  ;;  %v212_v35 = vld [vmem:[%s1034_s3 + $0x38] sm:$0xff]  ;;  %v222_v36 = vld [vmem:[%s1034_s3 + $0x88] sm:$0xff]  ;;  %v758_v37 = vpack.c.bf16 %v240_v32, %v230_v31 }
  0x3d   : > { %755 = vmatprep.subr.bf16.mxu0 %v754_v21  ;;  %751 = vmatprep.subr.bf16.mxu1 %v750_v29  ;;  %v239_v38 = vld [vmem:[%s1034_s3 + $0x110] sm:$0xff]  ;;  %v762_v39 = vpack.c.bf16 %v222_v36, %v212_v35  ;;  %v221_v41 = vld [vmem:[%s1034_s3 + $0x80] sm:$0xff]  ;;  %v214_v42 = vld [vmem:[%s1034_s3 + $0x48] sm:$0xff] }
  0x3e   : > { %v211_v40 = vld [vmem:[%s1034_s3 + $0x30] sm:$0xff]  ;;  %v224_v43 = vld [vmem:[%s1034_s3 + $0x98] sm:$0xff]  ;;  %v242_v46 = vld [vmem:[%s1034_s3 + $0x128] sm:$0xff]  ;;  %v760_v47 = vpack.c.bf16 %v239_v38, %v229_v34 }
  0x3f   : > { %730 = vmatmul.mubr.msk.f32.vlgmr.msra.gmra.mrb[0].mxu0 %vm246_vm0, %v245_v28  ;;  %753 = vmatpush1.bf16.msra.mxu1 %v752_v30  ;;  %v764_v44 = vpack.c.bf16 %v221_v41, %v211_v40  ;;  %v232_v45 = vld [vmem:[%s1034_s3 + $0xd8] sm:$0xff]  ;;  %v231_v49 = vld [vmem:[%s1034_s3 + $0xd0] sm:$0xff]  ;;  %v241_v50 = vld [vmem:[%s1034_s3 + $0x120] sm:$0xff]  ;;  %v770_v51 = vpack.c.bf16 %v224_v43, %v214_v42 }
  0x40   : > { %757 = vmatpush1.bf16.msra.mxu0 %v756_v33  ;;  %456 = vmatprep.mubr.f32.mxu0 %v925_v0  ;;  %v766_v48 = vpack.c.bf16 %v242_v46, %v232_v45  ;;  %v213_v52 = vld [vmem:[%s1034_s3 + $0x40] sm:$0xff]  ;;  %v223_v53 = vld [vmem:[%s1034_s3 + $0x90] sm:$0xff]  ;;  %v234_v54 = vld [vmem:[%s1034_s3 + $0xe8] sm:$0xff]  ;;  %v768_v56 = vpack.c.bf16 %v241_v50, %v231_v49 }
  0x41   : > { %759 = vmatprep.subr.bf16.mxu0 %v758_v37  ;;  %763 = vmatprep.subr.bf16.mxu1 %v762_v39  ;;  %v244_v55 = vld [vmem:[%s1034_s3 + $0x138] sm:$0xff]  ;;  %v772_v57 = vpack.c.bf16 %v223_v53, %v213_v52  ;;  %v233_v59 = vld [vmem:[%s1034_s3 + $0xe0] sm:$0xff]  ;;  %v243_v60 = vld [vmem:[%s1034_s3 + $0x130] sm:$0xff] }
  0x42   : > { %731 = vmatmul.mubr.msk.f32.vlgmr.msra.gmra.mrb[0].mxu1 %vm246_vm0, %v245_v28  ;;  %v774_v58 = vpack.c.bf16 %v244_v55, %v234_v54  ;;  %v776_v61 = vpack.c.bf16 %v243_v60, %v233_v59 }
  0x43   : > { %765 = vmatpush1.bf16.msra.mxu1 %v764_v44  ;;  %527 = vmatprep.mubr.f32.mxu1 %v925_v0 }
  0x44   : > { %761 = vmatpush1.bf16.msra.mxu0 %v760_v47  ;;  %767 = vmatprep.subr.bf16.mxu1 %v766_v48 }
  0x45   : > { %771 = vmatprep.subr.bf16.mxu0 %v770_v51 }
  0x47   : > { %732 = vmatmul.mubr.msk.f32.vlgmr.msra.gmra.mrb[2].mxu0 %vm246_vm0, %v245_v28  ;;  %769 = vmatpush1.bf16.msra.mxu1 %v768_v56 }
  0x48   : > { %773 = vmatpush1.bf16.msra.mxu0 %v772_v57  ;;  %598 = vmatprep.mubr.f32.mxu0 %v925_v0 }
  0x49   : > { %775 = vmatprep.subr.bf16.mxu0 %v774_v58 }
  0x4a   : > { %733 = vmatmul.mubr.msk.f32.vlgmr.msra.gmra.mrb[2].mxu1 %vm246_vm0, %v245_v28 }
  0x4c   : > { %777 = vmatpush1.bf16.msra.mxu0 %v776_v61 }
  0x4f   : > { %734 = vmatmul.mubr.msk.f32.vlgmr.msra.gmra.mrb[4].mxu0 %vm246_vm0, %v245_v28 }
 0x112   : > { %v316_v62 = vpop.f32.mrb[0].mxu0 }
 0x113   : > { %605 = vst [vmem:[%s203_s5] sm:$0xff] %v316_v62  ;;  %v318_v63 = vpop.f32.mrb[1].mxu0 }
 0x114   : > { %606 = vst [vmem:[%s203_s5 + $0x8] sm:$0xff] %v318_v63 }
 0x115   : > { %v387_v1 = vpop.f32.mrb[0].mxu1 }
 0x116   : > { %607 = vst [vmem:[%s203_s5 + $0x10] sm:$0xff] %v387_v1  ;;  %v389_v0 = vpop.f32.mrb[1].mxu1 }
 0x117   : > { %608 = vst [vmem:[%s203_s5 + $0x18] sm:$0xff] %v389_v0 }
 0x11a   : > { %v458_v2 = vpop.f32.mrb[2].mxu0 }
 0x11b   : > { %609 = vst [vmem:[%s203_s5 + $0x20] sm:$0xff] %v458_v2  ;;  %v460_v3 = vpop.f32.mrb[3].mxu0 }
 0x11c   : > { %610 = vst [vmem:[%s203_s5 + $0x28] sm:$0xff] %v460_v3 }
 0x11d   : > { %v529_v4 = vpop.f32.mrb[2].mxu1 }
 0x11e   : > { %611 = vst [vmem:[%s203_s5 + $0x30] sm:$0xff] %v529_v4  ;;  %v531_v5 = vpop.f32.mrb[3].mxu1 }
 0x11f   : > { %612 = vst [vmem:[%s203_s5 + $0x38] sm:$0xff] %v531_v5 }
 0x122   : > { %v600_v6 = vpop.f32.mrb[4].mxu0 }
 0x123   : > { %613 = vst [vmem:[%s203_s5 + $0x40] sm:$0xff] %v600_v6  ;;  %v602_v7 = vpop.f32.mrb[5].mxu0 }
 0x124   : > { %614 = vst [vmem:[%s203_s5 + $0x48] sm:$0xff] %v602_v7 }
 0x125 PF: > { %s15_s14 = sadd.s32 1, %s919_s14   ;;  %s1121_s9 = smov %s903_s10 }
 0x126   : > { %p12_p9 = scmp.ge.s32.totalorder %s15_s14, 6   ;;  %s1122_s10 = smov %s907_s11 }
 0x127   : > { %s1123_s11 = smov %s986_s20  ;;  %s1124_s12 = smov %s915_s13 }
 0x128   : > { %s1125_s13 = smov %s1127_s16  ;;  %14 = sbr.rel (!%p12_p9) target bundleno = 4 (0x4), region = 71 }
 0x12f   :  { %645 = vsyncpa [#allocation3], 1 }
 0x130   :  { %647 = vsyncpa [#allocation3 + $0x1], 1 }

// kernel: _answer_forward_impl.2
= control target key start
LH: loop header
LB: loop body
LE: loop exit
PB: predicated region body
PF: predicated region fallthrough
CT: control target
= control target key end

     0   :  { %v38_v0 = vlaneseq  ;;  %v507_v25 = vmov 0.0|0.0   ;;  %vm508_vm0 = vmmov 0   ;;  %v509_v32 = vmov 0.0   ;;  %s648_s1 = inlined_call_operand.vmem [shape: f32[8,8], index: 1, kind: input, shape index: {}]   ;;  %s649_s4 = inlined_call_operand.vmem [shape: f32[32,32], index: 4, kind: input, shape index: {}]   ;;  %s650_s3 = inlined_call_operand.vmem [shape: f32[32,32], index: 3, kind: input, shape index: {}]   ;;  %s651_s2 = inlined_call_operand.vmem [shape: f32[8,32], index: 2, kind: input, shape index: {}]   ;;  %s652_s0 = inlined_call_operand.vmem [shape: f32[8,8,32], index: 0, kind: input, shape index: {}]   ;;  %s653_s6 = inlined_call_operand.vmem [shape: f32[32,32], index: 6, kind: input, shape index: {}]   ;;  %s654_s5 = inlined_call_operand.vmem [shape: f32[1,32], index: 5, kind: input, shape index: {}]   ;;  %s655_s7 = inlined_call_operand.vmem [shape: f32[1,32], index: 7, kind: input, shape index: {}]   ;;  %s656_s8 = inlined_call_operand.vmem [shape: f32[8,32], index: 8, kind: output, shape index: {}]  }
   0x1   :  { %v37_v2 = vld [vmem:[%s648_s1] sm:$0xff]  ;;  %v165_v18 = vld [vmem:[%s649_s4 + $0x8] sm:$0xff]  ;;  %486 = vmatprep.subr.bf16.mxu0 %v507_v25  ;;  %492 = vmatprep.subr.bf16.mxu1 %v507_v25  ;;  %v166_v26 = vld [vmem:[%s649_s4 + $0x10] sm:$0xff]  ;;  %vm102_vm1 = vcmask 261120   ;;  %vm249_vm2 = vcmask 1041409   ;;  %vm251_vm3 = vcmask 1042434  }
   0x2   :  { %v39_v1 = vshrl.u32 %v38_v0, 7  ;;  %v164_v17 = vld [vmem:[%s649_s4] sm:$0xff]  ;;  %v160_v21 = vld [vmem:[%s650_s3 + $0x8] sm:$0xff]  ;;  %v167_v27 = vld [vmem:[%s649_s4 + $0x18] sm:$0xff]  ;;  %461 = vmatprep.mubr.msk.f32.mxu0 %vm508_vm0, %v509_v32  ;;  %472 = vmatprep.mubr.msk.f32.mxu1 %vm508_vm0, %v509_v32  ;;  %vm253_vm4 = vcmask 1043459   ;;  %vm255_vm5 = vcmask 1044484  }
   0x3   :  { %v487_v19 = vpack.c.bf16 %v165_v18, %v164_v17  ;;  %v159_v20 = vld [vmem:[%s650_s3] sm:$0xff]  ;;  %v490_v28 = vpack.c.bf16 %v167_v27, %v166_v26  ;;  %v161_v29 = vld [vmem:[%s650_s3 + $0x10] sm:$0xff]  ;;  %v162_v30 = vld [vmem:[%s650_s3 + $0x18] sm:$0xff]  ;;  %vm257_vm6 = vcmask 1045509   ;;  %vm259_vm7 = vcmask 1046534  }
   0x4   :  { %v54_v3 = vsub.s32 2, %v39_v1  ;;  %v40_v4 = vsub.s32 0, %v39_v1  ;;  %v61_v5 = vsub.s32 3, %v39_v1  ;;  %v47_v6 = vsub.s32 1, %v39_v1  ;;  %v163_v33 = vld [vmem:[%s651_s2] sm:$0xff]  ;;  %v31_v34 = vld [vmem:[%s652_s0 + $0x10] sm:$0xff] }
   0x5   :  { %v75_v11 = vsub.s32 5, %v39_v1  ;;  %v68_v12 = vsub.s32 4, %v39_v1  ;;  %v89_v15 = vsub.s32 7, %v39_v1  ;;  %v82_v16 = vsub.s32 6, %v39_v1  ;;  %488 = vmatpush3.bf16.msra.mxu0 %v487_v19  ;;  %v29_v35 = vld [vmem:[%s652_s0] sm:$0xff]  ;;  %v32_v40 = vld [vmem:[%s652_s0 + $0x18] sm:$0xff] }
   0x6   :  { %v55_v7 = vrot.slane %v37_v2, %v54_v3  ;;  %v41_v8 = vrot.slane %v37_v2, %v40_v4  ;;  %v62_v9 = vrot.slane %v37_v2, %v61_v5  ;;  %v48_v10 = vrot.slane %v37_v2, %v47_v6  ;;  %489 = vmatprep.subr.bf16.mxu0 %v507_v25  ;;  %v30_v41 = vld [vmem:[%s652_s0 + $0x8] sm:$0xff]  ;;  %v33_v53 = vld [vmem:[%s652_s0 + $0x20] sm:$0xff]  ;;  %v36_v4 = vld [vmem:[%s652_s0 + $0x38] sm:$0xff] }
   0x7   :  { %v76_v13 = vrot.slane %v37_v2, %v75_v11  ;;  %v69_v14 = vrot.slane %v37_v2, %v68_v12  ;;  %v90_v22 = vrot.slane %v37_v2, %v89_v15  ;;  %v83_v23 = vrot.slane %v37_v2, %v82_v16  ;;  %v34_v52 = vld [vmem:[%s652_s0 + $0x28] sm:$0xff]  ;;  %v35_v5 = vld [vmem:[%s652_s0 + $0x30] sm:$0xff] }
   0x8   :  { %57 = vbcast.lane.b32.xlu1 %v55_v7, 256  ;;  %43 = vbcast.lane.b32.xlu0 %v41_v8, 256  ;;  %v493_v24 = vpack.c.bf16 %v160_v21, %v159_v20  ;;  %v496_v31 = vpack.c.bf16 %v162_v30, %v161_v29  ;;  %vm261_vm8 = vcmask 1047559  }
   0x9   :  { %491 = vmatpush3.bf16.msra.mxu0 %v490_v28 }
   0xa   :  { %494 = vmatpush3.bf16.msra.mxu1 %v493_v24  ;;  %498 = vmatprep.subr.bf16.mxu0 %v507_v25 }
   0xb   :  { %495 = vmatprep.subr.bf16.mxu1 %v507_v25 }
   0xc   :  { %64 = vbcast.lane.b32.xlu1 %v62_v9, 256  ;;  %50 = vbcast.lane.b32.xlu0 %v48_v10, 256 }
   0xd   :  { %462 = vmatmul.mubr.msk.f32.vlgmr.msra.gmra.mrb[0].mxu0 %vm102_vm1, %v163_v33 }
   0xe   :  { %497 = vmatpush3.bf16.msra.mxu1 %v496_v31  ;;  %483 = vmatprep.mubr.msk.f32.mxu0 %vm508_vm0, %v509_v32 }
  0x10   :  { %78 = vbcast.lane.b32.xlu1 %v76_v13, 256  ;;  %71 = vbcast.lane.b32.xlu0 %v69_v14, 256 }
  0x14   :  { %92 = vbcast.lane.b32.xlu1 %v90_v22, 256  ;;  %85 = vbcast.lane.b32.xlu0 %v83_v23, 256 }
  0x7a   :  { %v58_v36 = vpop.permute.xlu1 %57  ;;  %v44_v37 = vpop.permute.xlu0 %43 }
  0x7b   :  { %v96_v38 = vmul.f32 %v58_v36, %v31_v34  ;;  %v94_v39 = vmul.f32 %v44_v37, %v29_v35 }
  0x7d   :  { %v117_v42 = vsel %vm102_vm1, %v96_v38, 0.0  ;;  %v103_v43 = vsel %vm102_vm1, %v94_v39, 0.0 }
  0x7e   :  { %v118_v44 = vrot.slane %v117_v42, 4  ;;  %v104_v45 = vrot.slane %v103_v43, 4  ;;  %v65_v46 = vpop.permute.xlu1 %64  ;;  %v51_v47 = vpop.permute.xlu0 %50 }
  0x7f   :  { %v97_v48 = vmul.f32 %v65_v46, %v32_v40  ;;  %v95_v49 = vmul.f32 %v51_v47, %v30_v41 }
  0x80   :  { %v119_v50 = vadd.f32 %v118_v44, %v117_v42  ;;  %v105_v51 = vadd.f32 %v104_v45, %v103_v43 }
  0x81   :  { %v124_v54 = vsel %vm102_vm1, %v97_v48, 0.0  ;;  %v110_v55 = vsel %vm102_vm1, %v95_v49, 0.0 }
  0x82   :  { %v120_v56 = vrot.slane %v119_v50, 2  ;;  %v106_v57 = vrot.slane %v105_v51, 2  ;;  %v125_v58 = vrot.slane %v124_v54, 4  ;;  %v111_v59 = vrot.slane %v110_v55, 4  ;;  %v79_v60 = vpop.permute.xlu1 %78  ;;  %v72_v61 = vpop.permute.xlu0 %71 }
  0x83   :  { %v99_v62 = vmul.f32 %v79_v60, %v34_v52  ;;  %v98_v63 = vmul.f32 %v72_v61, %v33_v53 }
  0x84   :  { %v121_v0 = vadd.f32 %v120_v56, %v119_v50  ;;  %v107_v1 = vadd.f32 %v106_v57, %v105_v51  ;;  %v126_v2 = vadd.f32 %v125_v58, %v124_v54  ;;  %v112_v3 = vadd.f32 %v111_v59, %v110_v55  ;;  %v344_v58 = vld [vmem:[%s653_s6] sm:$0xff]  ;;  %v345_v59 = vld [vmem:[%s653_s6 + $0x8] sm:$0xff] }
  0x85   :  { %v138_v6 = vsel %vm102_vm1, %v99_v62, 0.0  ;;  %v131_v7 = vsel %vm102_vm1, %v98_v63, 0.0  ;;  %v499_v60 = vpack.c.bf16 %v345_v59, %v344_v58  ;;  %v346_v63 = vld [vmem:[%s653_s6 + $0x10] sm:$0xff] }
  0x86   :  { %v127_v8 = vrot.slane %v126_v2, 2  ;;  %v113_v9 = vrot.slane %v112_v3, 2  ;;  %v93_v10 = vpop.permute.xlu1 %92  ;;  %v86_v11 = vpop.permute.xlu0 %85  ;;  %v139_v12 = vrot.slane %v138_v6, 4  ;;  %v132_v13 = vrot.slane %v131_v7, 4 }
  0x87   :  { %v101_v14 = vmul.f32 %v93_v10, %v36_v4  ;;  %v100_v15 = vmul.f32 %v86_v11, %v35_v5  ;;  %v122_v16 = vrot.slane %v121_v0, 1  ;;  %v108_v17 = vrot.slane %v107_v1, 1  ;;  %500 = vmatpush3.bf16.msra.mxu0 %v499_v60 }
  0x88   :  { %v128_v18 = vadd.f32 %v127_v8, %v126_v2  ;;  %v114_v19 = vadd.f32 %v113_v9, %v112_v3  ;;  %v140_v20 = vadd.f32 %v139_v12, %v138_v6  ;;  %v133_v21 = vadd.f32 %v132_v13, %v131_v7  ;;  %501 = vmatprep.subr.bf16.mxu0 %v507_v25  ;;  %v435_v3 = vld [vmem:[%s654_s5] ss:$0 sm:$0xff] }
  0x89   :  { %v152_v22 = vsel %vm102_vm1, %v101_v14, 0.0  ;;  %v145_v23 = vsel %vm102_vm1, %v100_v15, 0.0  ;;  %v109_v31 = vadd.f32 %v108_v17, %v107_v1  ;;  %v123_v35 = vadd.f32 %v122_v16, %v121_v0  ;;  %v347_v0 = vld [vmem:[%s653_s6 + $0x18] sm:$0xff]  ;;  %v436_v25 = vld [vmem:[%s655_s7] ss:$0 sm:$0xff] }
  0x8a   :  { %v129_v24 = vrot.slane %v128_v18, 1  ;;  %v115_v26 = vrot.slane %v114_v19, 1  ;;  %v153_v27 = vrot.slane %v152_v22, 4  ;;  %v146_v28 = vrot.slane %v145_v23, 4 }
  0x8b   :  { %v141_v29 = vrot.slane %v140_v20, 2  ;;  %v134_v30 = vrot.slane %v133_v21, 2  ;;  %v502_v1 = vpack.c.bf16 %v347_v0, %v346_v63 }
  0x8c   :  { %v116_v32 = vadd.f32 %v115_v26, %v114_v19  ;;  %v154_v33 = vadd.f32 %v153_v27, %v152_v22  ;;  %v147_v34 = vadd.f32 %v146_v28, %v145_v23  ;;  %v130_v38 = vadd.f32 %v129_v24, %v128_v18 }
  0x8d   :  { %v142_v36 = vadd.f32 %v141_v29, %v140_v20  ;;  %v135_v37 = vadd.f32 %v134_v30, %v133_v21  ;;  %503 = vmatpush3.bf16.msra.mxu0 %v502_v1 }
  0x8e   :  { %v250_v39 = vsel %vm249_vm2, %v116_v32, %v109_v31  ;;  %v155_v40 = vrot.slane %v154_v33, 2  ;;  %v148_v41 = vrot.slane %v147_v34, 2 }
  0x8f   :  { %v252_v42 = vsel %vm251_vm3, %v123_v35, %v250_v39  ;;  %v143_v43 = vrot.slane %v142_v36, 1  ;;  %v136_v44 = vrot.slane %v135_v37, 1 }
  0x90   :  { %v156_v45 = vadd.f32 %v155_v40, %v154_v33  ;;  %v149_v46 = vadd.f32 %v148_v41, %v147_v34  ;;  %v254_v47 = vsel %vm253_vm4, %v130_v38, %v252_v42 }
  0x91   :  { %v144_v48 = vadd.f32 %v143_v43, %v142_v36  ;;  %v137_v49 = vadd.f32 %v136_v44, %v135_v37 }
  0x92   :  { %v157_v50 = vrot.slane %v156_v45, 1  ;;  %v150_v51 = vrot.slane %v149_v46, 1 }
  0x93   :  { %v256_v52 = vsel %vm255_vm5, %v137_v49, %v254_v47 }
  0x94   :  { %v158_v53 = vadd.f32 %v157_v50, %v156_v45  ;;  %v151_v54 = vadd.f32 %v150_v51, %v149_v46  ;;  %v258_v55 = vsel %vm257_vm6, %v144_v48, %v256_v52 }
  0x96   :  { %v260_v56 = vsel %vm259_vm7, %v151_v54, %v258_v55 }
  0x97   :  { %v262_v57 = vsel %vm261_vm8, %v158_v53, %v260_v56 }
  0x98   :  { %473 = vmatmul.mubr.msk.f32.vlgmr.msra.gmra.mrb[0].mxu1 %vm102_vm1, %v262_v57 }
  0xe0   :  { %v237_v61 = vpop.f32.mrb[0].mxu0 }
  0xe1   :  { %v463_v62 = vpop.f32.mrb[1].mxu0 }
 0x16b   :  { %v331_v2 = vpop.f32.mrb[0].mxu1 }
 0x16c   :  { %v332_v4 = vadd.f32 %v331_v2, %v237_v61  ;;  %v474_v5 = vpop.f32.mrb[1].mxu1 }
 0x16e   :  { %v342_v6 = vadd.f32 %v435_v3, %v332_v4 }
 0x170   :  { %v343_v7 = vmax.f32 %v342_v6, 0.0 }
 0x172   :  { %484 = vmatmul.mubr.msk.f32.vlgmr.msra.gmra.mrb[2].mxu0 %vm102_vm1, %v343_v7 }
 0x245   :  { %v424_v8 = vpop.f32.mrb[2].mxu0 }
 0x246   :  { %v425_v9 = vadd.f32 %v436_v25, %v424_v8  ;;  %v485_v10 = vpop.f32.mrb[3].mxu0 }
 0x248   :  { %428 = vst.msk [vmem:[%s656_s8] sm:$0xff] %vm102_vm1, %v425_v9 }

</bundles_post_ra>
